<compile_context>
chip_gen: v7x
topology: tpu7x:2x2x1
jax: 0.10.0
libtpu: 0.0.40
codegen_flags: <defaults>
</compile_context>

<pallas_src>
import jax
import jax.numpy as jnp
from jax.experimental import pallas as pl
from jax.experimental.pallas import tpu as pltpu

HIDDEN = 768
_TB_MAX = 2048  # rows per batch tile (f32: 6 MiB/block, 12 MiB double-buffered)


def _sampling_policy_kernel(x_ref, w_ref, b_ref, o_ref):
    # x_ref: (TB, HIDDEN) native dtype; w_ref: (HIDDEN, 1) same dtype, resident
    # across the grid; b_ref: (1, 1) f32 in SMEM; o_ref: (TB, 1) f32.
    z = jnp.dot(x_ref[...], w_ref[...], preferred_element_type=jnp.float32)
    z = z + b_ref[0, 0]
    # 2 * sigmoid(z) == tanh(z / 2) + 1  (exact; one EUP transcendental per elem)
    o_ref[...] = jnp.tanh(z * 0.5) + 1.0


def sampling_policy_forward(prompt_embedding, weight, bias):
    """prompt_embedding: (B, 768) float dtype; weight: (768, 1); bias: (1,)."""
    B, H = prompt_embedding.shape
    assert H == HIDDEN

    x = prompt_embedding                                  # keep native dtype
    w = weight.reshape(HIDDEN, 1).astype(x.dtype)         # MXU column, matched dtype
    b = bias.reshape(1, 1).astype(jnp.float32)            # scalar -> SMEM

    # Batch tile: full batch if it fits (legal as a full-extent block even when
    # B isn't a multiple of 8); otherwise cap at _TB_MAX (multiple of 8 & 16)
    # and let Pallas mask the ragged last block.
    tb = B if B <= _TB_MAX else _TB_MAX
    grid = (pl.cdiv(B, tb),)

    itemsize = jnp.dtype(x.dtype).itemsize
    cost = pl.CostEstimate(
        flops=2 * B * HIDDEN,
        transcendentals=B,
        bytes_accessed=B * HIDDEN * itemsize + HIDDEN * itemsize + B * 4,
    )

    out = pl.pallas_call(
        _sampling_policy_kernel,
        out_shape=jax.ShapeDtypeStruct((B, 1), jnp.float32),
        grid_spec=pltpu.PrefetchScalarGridSpec(
            num_scalar_prefetch=0,
            grid=grid,
            in_specs=[
                pl.BlockSpec((tb, HIDDEN), lambda i: (i, 0)),       # batch tile
                pl.BlockSpec((HIDDEN, 1), lambda i: (0, 0)),        # resident weight
                pl.BlockSpec(memory_space=pltpu.MemorySpace.SMEM),  # bias scalar
            ],
            out_specs=pl.BlockSpec((tb, 1), lambda i: (i, 0)),
        ),
        compiler_params=pltpu.CompilerParams(
            dimension_semantics=("parallel",),   # shard batch tiles across TCs (v7x)
            vmem_limit_bytes=32 << 20,
        ),
        cost_estimate=cost,
    )(x, w, b)
    return out[:B]


if __name__ == "__main__":
    key = jax.random.PRNGKey(0)
    k_x, k_w, k_b = jax.random.split(key, 3)

    batch = 8
    # Deterministic synthetic parameters (mimic nn.Linear(768, 1) init shapes).
    bound = 1.0 / (HIDDEN ** 0.5)
    weight = jax.random.uniform(k_w, (HIDDEN, 1), jnp.float32, -bound, bound)
    bias = jax.random.uniform(k_b, (1,), jnp.float32, -bound, bound)

    prompt_embedding = jax.random.normal(k_x, (batch, HIDDEN), jnp.float32)

    out = sampling_policy_forward(prompt_embedding, weight, bias)
    out = jax.block_until_ready(out)

    # Reference check in plain JAX.
    ref = jax.nn.sigmoid(prompt_embedding @ weight + bias[None, :]) * 2.0
    assert out.shape == (batch, 1)
    assert out.dtype == jnp.float32
    assert jnp.allclose(out, ref, atol=2e-3, rtol=2e-3)

    # Native-bf16 embedding path (bf16 MXU, f32 accumulate; f32 output).
    x_bf16 = prompt_embedding.astype(jnp.bfloat16)
    out_bf16 = jax.block_until_ready(sampling_policy_forward(x_bf16, weight, bias))
    ref_bf16 = (
        jax.nn.sigmoid(x_bf16.astype(jnp.float32)
                       @ weight.astype(jnp.bfloat16).astype(jnp.float32)
                       + bias[None, :]) * 2.0
    )
    assert out_bf16.dtype == jnp.float32
    assert jnp.allclose(out_bf16, ref_bf16, atol=5e-2, rtol=5e-2)

    # Ragged batch (not a multiple of the sublane tile) — exercises cdiv grid.
    x_ragged = jax.random.normal(k_x, (13, HIDDEN), jnp.float32)
    out_ragged = jax.block_until_ready(sampling_policy_forward(x_ragged, weight, bias))
    ref_ragged = jax.nn.sigmoid(x_ragged @ weight + bias[None, :]) * 2.0
    assert out_ragged.shape == (13, 1)
    assert jnp.allclose(out_ragged, ref_ragged, atol=2e-3, rtol=2e-3)

    print("KERNEL_OK")
</pallas_src>

<mosaic_0001>
module attributes {stable_mosaic.version = 11 : i64} {
  func.func @_sampling_policy_kernel(%arg0: i32, %arg1: memref<8x768xf32, #tpu.memory_space<vmem>>, %arg2: memref<768x1xf32, #tpu.memory_space<vmem>>, %arg3: memref<1x1xf32, #tpu.memory_space<smem>>, %arg4: memref<8x1xf32, #tpu.memory_space<vmem>>) attributes {dimension_semantics = [#tpu.dimension_semantics<parallel>], iteration_bounds = array<i64: 1>, scalar_prefetch = 0 : i64, scratch_operands = 0 : i64, tpu.core_type = #tpu.core_type<tc>, window_params = [{transform_indices = @transform_0, window_bounds = array<i64: 8, 768>}, {pipeline_mode = #tpu.pipeline_mode<synchronous>, transform_indices = @transform_1, window_bounds = array<i64: 768, 1>}, {transform_indices = @transform_2, window_bounds = array<i64: 1, 1>}, {transform_indices = @transform_3, window_bounds = array<i64: 8, 1>}]} {
    %c0 = arith.constant 0 : index
    %c0_0 = arith.constant 0 : index
    %0 = vector.load %arg1[%c0, %c0_0] : memref<8x768xf32, #tpu.memory_space<vmem>>, vector<8x768xf32>
    %c0_1 = arith.constant 0 : index
    %c0_2 = arith.constant 0 : index
    %1 = vector.load %arg2[%c0_1, %c0_2] : memref<768x1xf32, #tpu.memory_space<vmem>>, vector<768x1xf32>
    %cst = arith.constant dense<0.000000e+00> : vector<8x1xf32>
    %2 = tpu.matmul %0, %1, %cst {dimension_numbers = #tpu.dot_dimension_numbers<[1], [0], [0], [1], [0, 0, 1, 1], [], []>} : vector<8x768xf32>, vector<768x1xf32>, vector<8x1xf32> -> vector<8x1xf32>
    %c0_3 = arith.constant 0 : index
    %c0_4 = arith.constant 0 : index
    %3 = memref.load %arg3[%c0_3, %c0_4] : memref<1x1xf32, #tpu.memory_space<smem>>
    %4 = vector.broadcast %3 : f32 to vector<8x1xf32>
    %5 = arith.addf %2, %4 : vector<8x1xf32>
    %cst_5 = arith.constant 5.000000e-01 : f32
    %6 = vector.broadcast %cst_5 : f32 to vector<8x1xf32>
    %7 = arith.mulf %5, %6 : vector<8x1xf32>
    %8 = math.tanh %7 : vector<8x1xf32>
    %cst_6 = arith.constant 1.000000e+00 : f32
    %9 = vector.broadcast %cst_6 : f32 to vector<8x1xf32>
    %10 = arith.addf %8, %9 : vector<8x1xf32>
    %c0_7 = arith.constant 0 : index
    %c0_8 = arith.constant 0 : index
    %11 = vector.load %arg4[%c0_7, %c0_8] : memref<8x1xf32, #tpu.memory_space<vmem>>, vector<8x1xf32>
    tpu.vector_store %arg4[%c0_7, %c0_8], %10 {strides = array<i32>} : memref<8x1xf32, #tpu.memory_space<vmem>>, vector<8x1xf32>,
    return
  }
  func.func @transform_0(%arg0: i32) -> (i32, i32) {
    %c0_i32 = arith.constant 0 : i32
    %c0_i32_0 = arith.constant 0 : i32
    return %arg0, %c0_i32 : i32, i32
  }
  func.func @transform_1(%arg0: i32) -> (i32, i32) {
    %c0_i32 = arith.constant 0 : i32
    %c0_i32_0 = arith.constant 0 : i32
    %c0_i32_1 = arith.constant 0 : i32
    return %c0_i32, %c0_i32_0 : i32, i32
  }
  func.func @transform_2(%arg0: i32) -> (i32, i32) {
    %c0_i32 = arith.constant 0 : i32
    %c0_i32_0 = arith.constant 0 : i32
    %c0_i32_1 = arith.constant 0 : i32
    return %c0_i32, %c0_i32_0 : i32, i32
  }
  func.func @transform_3(%arg0: i32) -> (i32, i32) {
    %c0_i32 = arith.constant 0 : i32
    %c0_i32_0 = arith.constant 0 : i32
    return %arg0, %c0_i32 : i32, i32
  }
}

</mosaic_0001>

<bundles_post_ra>
// kernel: tpu_custom_call.1
= control target key start
LH: loop header
LB: loop body
LE: loop exit
PB: predicated region body
PF: predicated region fallthrough
CT: control target
= control target key end

     0   :  { %vm332_vm0 = vcmask 7168   ;;  %s873_s1 = inlined_call_operand.vmem [shape: f32[768,1], index: 1, kind: input, shape index: {}]   ;;  %s874_s0 = inlined_call_operand.vmem [shape: f32[8,768], index: 0, kind: input, shape index: {}]   ;;  %s875_s2 = inlined_call_operand.<no memory space> [shape: f32[1,1], index: 2, kind: input, shape index: {}]   ;;  %s876_s3 = inlined_call_operand.vmem [shape: f32[8,1], index: 3, kind: output, shape index: {}]  }
   0x1   :  { %v37_v0 = vld [vmem:[%s873_s1 + $0x80] sm:$0xff]  ;;  %v38_v1 = vld [vmem:[%s873_s1 + $0x88] sm:$0xff]  ;;  %v39_v11 = vld [vmem:[%s873_s1 + $0x90] sm:$0xff] }
   0x2   :  { %v21_v2 = vld [vmem:[%s873_s1] sm:$0xff]  ;;  %v443_v3 = vpack.c.bf16 %v38_v1, %v37_v0  ;;  %v22_v4 = vld [vmem:[%s873_s1 + $0x8] sm:$0xff]  ;;  %v40_v13 = vld [vmem:[%s873_s1 + $0x98] sm:$0xff] }
   0x3   :  { %v69_v5 = vld [vmem:[%s873_s1 + $0x180] sm:$0xff]  ;;  %v70_v6 = vld [vmem:[%s873_s1 + $0x188] sm:$0xff]  ;;  %v445_v7 = vpack.c.bf16 %v22_v4, %v21_v2  ;;  %v23_v14 = vld [vmem:[%s873_s1 + $0x10] sm:$0xff]  ;;  %v447_v16 = vpack.c.bf16 %v40_v13, %v39_v11 }
   0x4   :  { %v475_v8 = vpack.c.bf16 %v70_v6, %v69_v5  ;;  %v53_v9 = vld [vmem:[%s873_s1 + $0x100] sm:$0xff]  ;;  %v54_v10 = vld [vmem:[%s873_s1 + $0x108] sm:$0xff]  ;;  %444 = vmatprep.subr.bf16.mxu0 %v443_v3  ;;  %v24_v15 = vld [vmem:[%s873_s1 + $0x18] sm:$0xff] }
   0x5   :  { %v477_v12 = vpack.c.bf16 %v54_v10, %v53_v9  ;;  %446 = vmatpush3.bf16.msra.mxu0 %v445_v7  ;;  %v449_v17 = vpack.c.bf16 %v24_v15, %v23_v14  ;;  %v71_v18 = vld [vmem:[%s873_s1 + $0x190] sm:$0xff]  ;;  %v72_v19 = vld [vmem:[%s873_s1 + $0x198] sm:$0xff]  ;;  %v41_v23 = vld [vmem:[%s873_s1 + $0xa0] sm:$0xff] }
   0x6   :  { %476 = vmatprep.subr.bf16.mxu1 %v475_v8  ;;  %v55_v20 = vld [vmem:[%s873_s1 + $0x110] sm:$0xff]  ;;  %v479_v21 = vpack.c.bf16 %v72_v19, %v71_v18  ;;  %v56_v22 = vld [vmem:[%s873_s1 + $0x118] sm:$0xff]  ;;  %v42_v24 = vld [vmem:[%s873_s1 + $0xa8] sm:$0xff]  ;;  %448 = vmatprep.subr.bf16.mxu0 %v447_v16 }
   0x7   :  { %478 = vmatpush3.bf16.msra.mxu1 %v477_v12  ;;  %v481_v25 = vpack.c.bf16 %v56_v22, %v55_v20  ;;  %v451_v26 = vpack.c.bf16 %v42_v24, %v41_v23  ;;  %v25_v27 = vld [vmem:[%s873_s1 + $0x20] sm:$0xff]  ;;  %v26_v28 = vld [vmem:[%s873_s1 + $0x28] sm:$0xff]  ;;  %v43_v35 = vld [vmem:[%s873_s1 + $0xb0] sm:$0xff] }
   0x8   :  { %v73_v29 = vld [vmem:[%s873_s1 + $0x1a0] sm:$0xff]  ;;  %480 = vmatprep.subr.bf16.mxu1 %v479_v21  ;;  %v74_v30 = vld [vmem:[%s873_s1 + $0x1a8] sm:$0xff]  ;;  %v453_v33 = vpack.c.bf16 %v26_v28, %v25_v27  ;;  %v44_v36 = vld [vmem:[%s873_s1 + $0xb8] sm:$0xff] }
   0x9   :  { %v57_v31 = vld [vmem:[%s873_s1 + $0x120] sm:$0xff]  ;;  %v58_v32 = vld [vmem:[%s873_s1 + $0x128] sm:$0xff]  ;;  %450 = vmatpush3.bf16.msra.mxu0 %v449_v17  ;;  %v483_v34 = vpack.c.bf16 %v74_v30, %v73_v29  ;;  %v27_v37 = vld [vmem:[%s873_s1 + $0x30] sm:$0xff]  ;;  %v455_v39 = vpack.c.bf16 %v44_v36, %v43_v35 }
   0xa   :  { %452 = vmatprep.subr.bf16.mxu0 %v451_v26  ;;  %v485_v38 = vpack.c.bf16 %v58_v32, %v57_v31  ;;  %v28_v40 = vld [vmem:[%s873_s1 + $0x38] sm:$0xff]  ;;  %v75_v41 = vld [vmem:[%s873_s1 + $0x1b0] sm:$0xff]  ;;  %v45_v46 = vld [vmem:[%s873_s1 + $0xc0] sm:$0xff] }
   0xb   :  { %482 = vmatpush3.bf16.msra.mxu1 %v481_v25  ;;  %v76_v42 = vld [vmem:[%s873_s1 + $0x1b8] sm:$0xff]  ;;  %v59_v44 = vld [vmem:[%s873_s1 + $0x130] sm:$0xff]  ;;  %v46_v47 = vld [vmem:[%s873_s1 + $0xc8] sm:$0xff]  ;;  %v457_v48 = vpack.c.bf16 %v28_v40, %v27_v37 }
   0xc   :  { %484 = vmatprep.subr.bf16.mxu1 %v483_v34  ;;  %v487_v43 = vpack.c.bf16 %v76_v42, %v75_v41  ;;  %v60_v45 = vld [vmem:[%s873_s1 + $0x138] sm:$0xff]  ;;  %v77_v49 = vld [vmem:[%s873_s1 + $0x1c0] sm:$0xff]  ;;  %v78_v50 = vld [vmem:[%s873_s1 + $0x1c8] sm:$0xff]  ;;  %v459_v52 = vpack.c.bf16 %v46_v47, %v45_v46 }
   0xd   :  { %454 = vmatpush3.bf16.msra.mxu0 %v453_v33  ;;  %v489_v51 = vpack.c.bf16 %v60_v45, %v59_v44  ;;  %v29_v53 = vld [vmem:[%s873_s1 + $0x40] sm:$0xff]  ;;  %v30_v54 = vld [vmem:[%s873_s1 + $0x48] sm:$0xff]  ;;  %v491_v56 = vpack.c.bf16 %v78_v50, %v77_v49  ;;  %v47_v58 = vld [vmem:[%s873_s1 + $0xd0] sm:$0xff] }
   0xe   :  { %456 = vmatprep.subr.bf16.mxu0 %v455_v39  ;;  %v61_v55 = vld [vmem:[%s873_s1 + $0x140] sm:$0xff]  ;;  %v62_v57 = vld [vmem:[%s873_s1 + $0x148] sm:$0xff]  ;;  %v48_v59 = vld [vmem:[%s873_s1 + $0xd8] sm:$0xff]  ;;  %v461_v62 = vpack.c.bf16 %v30_v54, %v29_v53 }
   0xf   :  { %486 = vmatpush3.bf16.msra.mxu1 %v485_v38  ;;  %v79_v60 = vld [vmem:[%s873_s1 + $0x1d0] sm:$0xff]  ;;  %v80_v61 = vld [vmem:[%s873_s1 + $0x1d8] sm:$0xff]  ;;  %v493_v63 = vpack.c.bf16 %v62_v57, %v61_v55  ;;  %v463_v0 = vpack.c.bf16 %v48_v59, %v47_v58  ;;  %v49_v6 = vld [vmem:[%s873_s1 + $0xe0] sm:$0xff] }
  0x10   :  { %488 = vmatprep.subr.bf16.mxu1 %v487_v43  ;;  %v31_v1 = vld [vmem:[%s873_s1 + $0x50] sm:$0xff]  ;;  %v32_v2 = vld [vmem:[%s873_s1 + $0x58] sm:$0xff]  ;;  %v495_v4 = vpack.c.bf16 %v80_v61, %v79_v60  ;;  %v50_v7 = vld [vmem:[%s873_s1 + $0xe8] sm:$0xff] }
  0x11   :  { %458 = vmatpush3.bf16.msra.mxu0 %v457_v48  ;;  %v63_v3 = vld [vmem:[%s873_s1 + $0x150] sm:$0xff]  ;;  %v64_v5 = vld [vmem:[%s873_s1 + $0x158] sm:$0xff]  ;;  %v81_v8 = vld [vmem:[%s873_s1 + $0x1e0] sm:$0xff]  ;;  %v465_v10 = vpack.c.bf16 %v32_v2, %v31_v1  ;;  %v467_v14 = vpack.c.bf16 %v50_v7, %v49_v6 }
  0x12   :  { %460 = vmatprep.subr.bf16.mxu0 %v459_v52  ;;  %v82_v9 = vld [vmem:[%s873_s1 + $0x1e8] sm:$0xff]  ;;  %v33_v11 = vld [vmem:[%s873_s1 + $0x60] sm:$0xff]  ;;  %v497_v13 = vpack.c.bf16 %v64_v5, %v63_v3  ;;  %v51_v19 = vld [vmem:[%s873_s1 + $0xf0] sm:$0xff] }
  0x13   :  { %490 = vmatpush3.bf16.msra.mxu1 %v489_v51  ;;  %v16_v12 = vld [vmem:[%s874_s0 + $0x8] sm:$0xff]  ;;  %v65_v16 = vld [vmem:[%s873_s1 + $0x160] sm:$0xff]  ;;  %v499_v18 = vpack.c.bf16 %v82_v9, %v81_v8  ;;  %v52_v20 = vld [vmem:[%s873_s1 + $0xf8] sm:$0xff] }
  0x14   :  { %492 = vmatprep.subr.bf16.mxu1 %v491_v56  ;;  %v34_v15 = vld [vmem:[%s873_s1 + $0x68] sm:$0xff]  ;;  %183 = vmatprep.mubr.f32.mxu0 %v16_v12  ;;  %v18_v21 = vld [vmem:[%s874_s0 + $0x18] sm:$0xff]  ;;  %v83_v22 = vld [vmem:[%s873_s1 + $0x1f0] sm:$0xff]  ;;  %v471_v26 = vpack.c.bf16 %v52_v20, %v51_v19 }
  0x15   :  { %462 = vmatpush3.bf16.msra.mxu0 %v461_v62  ;;  %v66_v17 = vld [vmem:[%s873_s1 + $0x168] sm:$0xff]  ;;  %v84_v23 = vld [vmem:[%s873_s1 + $0x1f8] sm:$0xff]  ;;  %253 = vmatprep.mubr.f32.mxu1 %v18_v21  ;;  %v469_v24 = vpack.c.bf16 %v34_v15, %v33_v11  ;;  %v35_v27 = vld [vmem:[%s873_s1 + $0x70] sm:$0xff] }
  0x16   :  { %464 = vmatprep.subr.bf16.mxu0 %v463_v0  ;;  %v501_v25 = vpack.c.bf16 %v66_v17, %v65_v16  ;;  %v36_v28 = vld [vmem:[%s873_s1 + $0x78] sm:$0xff]  ;;  %v67_v29 = vld [vmem:[%s873_s1 + $0x170] sm:$0xff]  ;;  %v503_v30 = vpack.c.bf16 %v84_v23, %v83_v22  ;;  %v101_v32 = vld [vmem:[%s873_s1 + $0x280] sm:$0xff]  ;;  %v118_v23 = vstv %s875_s2 }
  0x17   :  { %494 = vmatpush3.bf16.msra.mxu1 %v493_v63  ;;  %v68_v31 = vld [vmem:[%s873_s1 + $0x178] sm:$0xff]  ;;  %v102_v33 = vld [vmem:[%s873_s1 + $0x288] sm:$0xff]  ;;  %v473_v34 = vpack.c.bf16 %v36_v28, %v35_v27  ;;  %v85_v37 = vld [vmem:[%s873_s1 + $0x200] sm:$0xff] }
  0x18   :  { %496 = vmatprep.subr.bf16.mxu1 %v495_v4  ;;  %v505_v35 = vpack.c.bf16 %v68_v31, %v67_v29  ;;  %v507_v36 = vpack.c.bf16 %v102_v33, %v101_v32  ;;  %v86_v38 = vld [vmem:[%s873_s1 + $0x208] sm:$0xff]  ;;  %v103_v39 = vld [vmem:[%s873_s1 + $0x290] sm:$0xff]  ;;  %v104_v40 = vld [vmem:[%s873_s1 + $0x298] sm:$0xff] }
  0x19   :  { %466 = vmatpush3.bf16.msra.mxu0 %v465_v10  ;;  %v15_v41 = vld [vmem:[%s874_s0] sm:$0xff]  ;;  %v509_v42 = vpack.c.bf16 %v86_v38, %v85_v37  ;;  %v17_v43 = vld [vmem:[%s874_s0 + $0x10] sm:$0xff]  ;;  %v511_v44 = vpack.c.bf16 %v104_v40, %v103_v39  ;;  %v88_v46 = vld [vmem:[%s873_s1 + $0x218] sm:$0xff] }
  0x1a   :  { %468 = vmatprep.subr.bf16.mxu0 %v467_v14  ;;  %v87_v45 = vld [vmem:[%s873_s1 + $0x210] sm:$0xff]  ;;  %v105_v47 = vld [vmem:[%s873_s1 + $0x2a0] sm:$0xff]  ;;  %v106_v48 = vld [vmem:[%s873_s1 + $0x2a8] sm:$0xff] }
  0x1b   :  { %498 = vmatpush3.bf16.msra.mxu1 %v497_v13  ;;  %v20_v49 = vld [vmem:[%s874_s0 + $0x28] sm:$0xff]  ;;  %v513_v50 = vpack.c.bf16 %v88_v46, %v87_v45  ;;  %v515_v51 = vpack.c.bf16 %v106_v48, %v105_v47  ;;  %v89_v52 = vld [vmem:[%s873_s1 + $0x220] sm:$0xff]  ;;  %v107_v54 = vld [vmem:[%s873_s1 + $0x2b0] sm:$0xff] }
  0x1c   :  { %500 = vmatprep.subr.bf16.mxu1 %v499_v18  ;;  %v90_v53 = vld [vmem:[%s873_s1 + $0x228] sm:$0xff]  ;;  %v108_v55 = vld [vmem:[%s873_s1 + $0x2b8] sm:$0xff]  ;;  %v91_v58 = vld [vmem:[%s873_s1 + $0x230] sm:$0xff] }
  0x1d   :  { %470 = vmatpush3.bf16.msra.mxu0 %v469_v24  ;;  %v517_v56 = vpack.c.bf16 %v90_v53, %v89_v52  ;;  %v519_v57 = vpack.c.bf16 %v108_v55, %v107_v54  ;;  %v92_v59 = vld [vmem:[%s873_s1 + $0x238] sm:$0xff]  ;;  %v109_v60 = vld [vmem:[%s873_s1 + $0x2c0] sm:$0xff]  ;;  %v110_v61 = vld [vmem:[%s873_s1 + $0x2c8] sm:$0xff] }
  0x1e   :  { %472 = vmatprep.subr.bf16.mxu0 %v471_v26  ;;  %v521_v62 = vpack.c.bf16 %v92_v59, %v91_v58  ;;  %v523_v63 = vpack.c.bf16 %v110_v61, %v109_v60  ;;  %v93_v0 = vld [vmem:[%s873_s1 + $0x240] sm:$0xff]  ;;  %v94_v1 = vld [vmem:[%s873_s1 + $0x248] sm:$0xff]  ;;  %v111_v2 = vld [vmem:[%s873_s1 + $0x2d0] sm:$0xff] }
  0x1f   :  { %502 = vmatpush3.bf16.msra.mxu1 %v501_v25  ;;  %v112_v3 = vld [vmem:[%s873_s1 + $0x2d8] sm:$0xff]  ;;  %v525_v4 = vpack.c.bf16 %v94_v1, %v93_v0  ;;  %v95_v6 = vld [vmem:[%s873_s1 + $0x250] sm:$0xff]  ;;  %v113_v8 = vld [vmem:[%s873_s1 + $0x2e0] sm:$0xff] }
  0x20   :  { %504 = vmatprep.subr.bf16.mxu1 %v503_v30  ;;  %v527_v5 = vpack.c.bf16 %v112_v3, %v111_v2  ;;  %v96_v7 = vld [vmem:[%s873_s1 + $0x258] sm:$0xff]  ;;  %v114_v9 = vld [vmem:[%s873_s1 + $0x2e8] sm:$0xff]  ;;  %v97_v12 = vld [vmem:[%s873_s1 + $0x260] sm:$0xff] }
  0x21   :  { %474 = vmatpush3.bf16.msra.mxu0 %v473_v34  ;;  %v529_v10 = vpack.c.bf16 %v96_v7, %v95_v6  ;;  %v531_v11 = vpack.c.bf16 %v114_v9, %v113_v8  ;;  %v98_v13 = vld [vmem:[%s873_s1 + $0x268] sm:$0xff]  ;;  %v115_v14 = vld [vmem:[%s873_s1 + $0x2f0] sm:$0xff]  ;;  %v116_v15 = vld [vmem:[%s873_s1 + $0x2f8] sm:$0xff] }
  0x22   :  { %508 = vmatprep.subr.bf16.mxu0 %v507_v36  ;;  %v533_v16 = vpack.c.bf16 %v98_v13, %v97_v12  ;;  %v535_v17 = vpack.c.bf16 %v116_v15, %v115_v14  ;;  %v99_v18 = vld [vmem:[%s873_s1 + $0x270] sm:$0xff]  ;;  %v100_v19 = vld [vmem:[%s873_s1 + $0x278] sm:$0xff]  ;;  %v19_v21 = vld [vmem:[%s874_s0 + $0x20] sm:$0xff] }
  0x23   :  { %506 = vmatpush3.bf16.msra.mxu1 %v505_v35  ;;  %v537_v20 = vpack.c.bf16 %v100_v19, %v99_v18 }
  0x24   :  { %184 = vmatmul.mubr.f32.vlgmr.msra.gmra.mrb[0].mxu0 %v15_v41 }
  0x25   :  { %510 = vmatpush3.bf16.msra.mxu0 %v509_v42  ;;  %323 = vmatprep.mubr.f32.mxu0 %v20_v49 }
  0x26   :  { %254 = vmatmul.mubr.f32.vlgmr.msra.gmra.mrb[0].mxu1 %v17_v43  ;;  %512 = vmatprep.subr.bf16.mxu0 %v511_v44 }
  0x29   :  { %514 = vmatpush3.bf16.msra.mxu0 %v513_v50 }
  0x2a   :  { %516 = vmatprep.subr.bf16.mxu0 %v515_v51 }
  0x2d   :  { %518 = vmatpush3.bf16.msra.mxu0 %v517_v56 }
  0x2e   :  { %520 = vmatprep.subr.bf16.mxu0 %v519_v57 }
  0x31   :  { %522 = vmatpush3.bf16.msra.mxu0 %v521_v62 }
  0x32   :  { %524 = vmatprep.subr.bf16.mxu0 %v523_v63 }
  0x35   :  { %526 = vmatpush3.bf16.msra.mxu0 %v525_v4 }
  0x36   :  { %528 = vmatprep.subr.bf16.mxu0 %v527_v5 }
  0x39   :  { %530 = vmatpush3.bf16.msra.mxu0 %v529_v10 }
  0x3a   :  { %532 = vmatprep.subr.bf16.mxu0 %v531_v11 }
  0x3d   :  { %534 = vmatpush3.bf16.msra.mxu0 %v533_v16 }
  0x3e   :  { %536 = vmatprep.subr.bf16.mxu0 %v535_v17 }
  0x41   :  { %538 = vmatpush3.bf16.msra.mxu0 %v537_v20 }
  0x44   :  { %324 = vmatmul.mubr.f32.vlgmr.msra.gmra.mrb[2].mxu0 %v19_v21 }
  0xf7   :  { %v370_v22 = vpop.f32.mrb[0].mxu0 }
  0xf8   :  { %v371_v24 = vpop.f32.mrb[1].mxu0 }
  0xf9   :  { %v405_v25 = vpop.f32.mrb[0].mxu1  ;;  %v372_v26 = vadd.f32 %v371_v24, %v370_v22 }
  0xfa   :  { %v406_v27 = vpop.f32.mrb[1].mxu1 }
  0xfb   :  { %v407_v28 = vadd.f32 %v406_v27, %v405_v25  ;;  %v186_v29 = vadd.f32 %v372_v26, %v118_v23 }
  0xfd   :  { %v256_v30 = vadd.f32 %v407_v28, %v186_v29 }
 0x117   :  { %v440_v31 = vpop.f32.mrb[2].mxu0 }
 0x118   :  { %v441_v32 = vpop.f32.mrb[3].mxu0 }
 0x119   :  { %v442_v33 = vadd.f32 %v441_v32, %v440_v31 }
 0x11b   :  { %v326_v34 = vadd.f32 %v442_v33, %v256_v30 }
 0x11d   :  { %v329_v35 = vmul.f32 0.5, %v326_v34 }
 0x11f   :  { %539 = vtanh.f32 %v329_v35 }
 0x129   :  { %v540_v36 = vpop.eup %539 }
 0x12a   :  { %v331_v37 = vadd.f32 1.0, %v540_v36 }
 0x12c   :  { %333 = vst.msk [vmem:[%s876_s3] sm:$0xff] %vm332_vm0, %v331_v37 }

</bundles_post_ra>
